<compile_context>
chip_gen: v7x
topology: tpu7x:2x2x1
jax: 0.10.0
libtpu: 0.0.40
codegen_flags: <defaults>
</compile_context>

<pallas_src>
import functools

import jax
import jax.numpy as jnp
from jax.experimental import pallas as pl
from jax.experimental.pallas import tpu as pltpu

NUM_TARGETS = 13        # output_dim for is_regression=True, target='all'
FEAT_DIM = 64           # stand-in for MODEL_DIMS[model_name]
HIDDEN_DIM = 32         # hidden_dim of the two-layer head

MAX_UNROLLED_LANE_BLOCKS = 16   # beyond this, use lax.fori_loop(unroll=8)


def _round_up(x, m):
    return ((x + m - 1) // m) * m


def _divisors(n):
    return [d for d in range(1, n + 1) if n % d == 0]


def _medparam_kernel(x_ref, w12r_ref, b12_ref, sel_ref, w2_ref, b2_ref,
                     out_ref, acc_ref, *, n_full, lane_rem):
    """One (row-tile, spatial-tile) grid step.

    x_ref    : (TR, TS)        spatial chunk of the [B*C, H*W] slab (streamed)
    w12r_ref : (TR, HIDDEN)    fused (wb @ w1)[r % C] rows, pre-scaled by 1/HW
    b12_ref  : (1, HIDDEN)     fused bias (bb @ w1 + b1)
    sel_ref  : (OB, TR)        rows -> batch segment-sum selection matrix
    w2_ref   : (HIDDEN, OUTP)  linear2 weight, lane-padded to 128
    b2_ref   : (1, OUTP)
    out_ref  : (OB, OUTP)      written only on the last spatial step
    acc_ref  : (TR, 128)       lane-wide spatial partial sums (f32 scratch)
    """
    j = pl.program_id(1)

    @pl.when(j == 0)
    def _init():
        acc_ref[...] = jnp.zeros_like(acc_ref)

    # Steady state: lane-wide VPU adds only; the single cross-lane XLU reduce is
    # deferred to the finalize.  bf16 chunks promote into the f32 accumulator.
    if n_full > 0:
        acc = acc_ref[...]
        if n_full <= MAX_UNROLLED_LANE_BLOCKS:
            for lb in range(n_full):
                acc = acc + x_ref[:, lb * 128:(lb + 1) * 128].astype(jnp.float32)
        else:
            def body(lb, a):
                off = pl.multiple_of(lb * 128, 128)
                return a + x_ref[:, pl.ds(off, 128)].astype(jnp.float32)
            acc = jax.lax.fori_loop(0, n_full, body, acc, unroll=8)
        acc_ref[...] = acc

    if lane_rem > 0:
        # Only reachable when n_st == 1 and S % 128 != 0 (keeps the path pad-free).
        tail = x_ref[:, n_full * 128:n_full * 128 + lane_rem].astype(jnp.float32)
        acc_ref[:, :lane_rem] = acc_ref[:, :lane_rem] + tail

    # NOTE: this relies on the spatial axis being the innermost grid dimension
    # with a constant output block index across it; do not reorder the grid.
    @pl.when(j == pl.num_programs(1) - 1)
    def _finalize():
        pooled = jnp.sum(acc_ref[...], axis=-1, keepdims=True)            # (TR, 1)
        scaled = pooled * w12r_ref[...]                                    # (TR, H)
        hidden = jnp.dot(sel_ref[...], scaled,
                         preferred_element_type=jnp.float32) + b12_ref[...]   # (OB, H)
        hidden = jnp.maximum(hidden, 0.0)
        out = jnp.dot(hidden, w2_ref[...],
                      preferred_element_type=jnp.float32) + b2_ref[...]        # (OB, OUTP)
        out_ref[...] = out.astype(out_ref.dtype)


def _choose_row_tile(B, C, max_rows):
    """TB divides B, (TB*C) % 8 == 0, TB*C <= max_rows; prefer >= 2 batch tiles
    (dual-TC sharding on v7x) as long as the row tile stays reasonably full."""
    valid = [tb for tb in _divisors(B) if (tb * C) % 8 == 0 and tb * C <= max_rows]
    if not valid:
        return B, 1                       # single tile: full first dim is always legal
    multi = [tb for tb in valid if B // tb >= 2 and tb * C >= 64]
    tb = max(multi) if multi else max(valid)
    return tb, B // tb


def _choose_spatial_tile(S, TR, elem_bytes, target_block_bytes):
    """Largest multiple-of-128 divisor of S within the block budget, or full S."""
    max_ts = max(128, (target_block_bytes // max(TR * elem_bytes, 1)) // 128 * 128)
    if S <= max_ts or S % 128 != 0:
        # One spatial step; block dim == full array dim is always legal.
        # TODO(synk): if S were huge AND not 128-aligned, split off a 128-aligned head.
        return S, 1
    ts = 128
    for d in range(max_ts, 127, -128):
        if S % d == 0:
            ts = d
            break
    return ts, S // ts


def medical_parameters_forward(x_nchw, params, *, target_block_bytes=4 << 20,
                               max_row_tile=128):
    """x_nchw: [B, C, H, W] float32 (or bfloat16). Returns [B, NUM_TARGETS] float32.

    target_block_bytes: x bytes per grid step.  4 MiB is a safe default across
    v5e/v6e/v7x; raise it on v6e (e.g. toward full S) for fewer grid steps.
    """
    B, C, H, W = x_nchw.shape
    S = H * W
    wb, bb, w1, b1, w2, b2 = params
    hidden_dim = w1.shape[1]
    out_dim = w2.shape[1]
    elem_bytes = jnp.dtype(x_nchw.dtype).itemsize

    # ---- algebraic fusion of GAP-projection and linear1 (exact up to f32) ----
    w12 = jnp.matmul(wb, w1, precision=jax.lax.Precision.HIGHEST)        # (C, H)
    b12 = jnp.matmul(bb, w1, precision=jax.lax.Precision.HIGHEST) + b1   # (1, H)

    # ---- tile sizing (chosen so x is never padded / copied) -----------------
    TB, n_bt = _choose_row_tile(B, C, max_row_tile)
    TR = TB * C
    TS, n_st = _choose_spatial_tile(S, TR, elem_bytes, target_block_bytes)
    OB = _round_up(TB, 8)                  # output rows per tile (sublane aligned)
    out_pad = _round_up(out_dim, 128)      # lane-dense output stores
    n_full, lane_rem = TS // 128, TS % 128

    # ---- operand prep (x reshape merges contiguous dims: no HBM copy) -------
    x2d = x_nchw.reshape(B * C, S)

    inv_hw = 1.0 / float(S)                # fold the mean into the fused weight
    w12_rows = jnp.tile(w12, (TB, 1)).astype(jnp.float32) * inv_hw       # (TR, H)
    b12 = b12.astype(jnp.float32)

    t_idx = jnp.arange(OB)[:, None]
    r_idx = jnp.arange(TR)[None, :]
    sel = ((r_idx // C) == t_idx).astype(jnp.float32)                    # (OB, TR)

    w2_pad = jnp.pad(w2.astype(jnp.float32), ((0, 0), (0, out_pad - out_dim)))
    b2_pad = jnp.pad(b2.astype(jnp.float32), ((0, 0), (0, out_pad - out_dim)))

    # ---- VMEM budget / scheduler hints ---------------------------------------
    x_block_bytes = TR * TS * elem_bytes
    resident_bytes = 4 * (TR * hidden_dim + hidden_dim + OB * TR
                          + hidden_dim * out_pad + out_pad)
    acc_bytes = TR * 128 * 4
    out_block_bytes = OB * out_pad * 4
    need = 2 * x_block_bytes + 2 * out_block_bytes + 2 * resident_bytes + acc_bytes
    # >= 32 MiB (above v5e's 16 MiB scoped default), <= 48 MiB (v7x has 64 MiB VMEM).
    vmem_limit = int(min(max(need * 3 // 2 + (2 << 20), 32 << 20), 48 << 20))

    cost = pl.CostEstimate(
        flops=2 * B * C * S
        + 2 * n_bt * (OB * TR * hidden_dim + OB * hidden_dim * out_pad),
        transcendentals=0,
        bytes_accessed=B * C * S * elem_bytes + resident_bytes
        + n_bt * out_block_bytes)

    kernel = functools.partial(_medparam_kernel, n_full=n_full, lane_rem=lane_rem)
    out = pl.pallas_call(
        kernel,
        out_shape=jax.ShapeDtypeStruct((n_bt * OB, out_pad), jnp.float32),
        grid=(n_bt, n_st),
        in_specs=[
            pl.BlockSpec((TR, TS), lambda i, j: (i, j)),           # streamed x
            pl.BlockSpec((TR, hidden_dim), lambda i, j: (0, 0)),   # VMEM-resident
            pl.BlockSpec((1, hidden_dim), lambda i, j: (0, 0)),
            pl.BlockSpec((OB, TR), lambda i, j: (0, 0)),
            pl.BlockSpec((hidden_dim, out_pad), lambda i, j: (0, 0)),
            pl.BlockSpec((1, out_pad), lambda i, j: (0, 0)),
        ],
        out_specs=pl.BlockSpec((OB, out_pad), lambda i, j: (i, 0)),
        scratch_shapes=[pltpu.VMEM((TR, 128), jnp.float32)],
        compiler_params=pltpu.CompilerParams(
            dimension_semantics=("parallel", "arbitrary"),
            vmem_limit_bytes=vmem_limit),
        cost_estimate=cost,
    )(x2d, w12_rows, b12, sel, w2_pad, b2_pad)

    # Un-pad: per-tile OB rows -> TB valid batches (tiny), then crop lanes.
    out = out.reshape(n_bt, OB, out_pad)[:, :TB, :].reshape(n_bt * TB, out_pad)
    return out[:, :out_dim]


def init_params(C):
    # Deterministic parameter initialization (synthetic weights).
    k = jax.random.PRNGKey(42)
    k_wb, k_bb, k_w1, k_b1, k_w2, k_b2 = jax.random.split(k, 6)
    wb = jax.random.normal(k_wb, (C, FEAT_DIM), jnp.float32) * 0.05          # backbone proj
    bb = jax.random.normal(k_bb, (1, FEAT_DIM), jnp.float32) * 0.01
    w1 = jax.random.normal(k_w1, (FEAT_DIM, HIDDEN_DIM), jnp.float32) * 0.05  # linear1
    b1 = jax.random.normal(k_b1, (1, HIDDEN_DIM), jnp.float32) * 0.01
    w2 = jax.random.normal(k_w2, (HIDDEN_DIM, NUM_TARGETS), jnp.float32) * 0.05  # linear2
    b2 = jax.random.normal(k_b2, (1, NUM_TARGETS), jnp.float32) * 0.01
    return wb, bb, w1, b1, w2, b2


def reference_forward(x_nchw, params):
    wb, bb, w1, b1, w2, b2 = params
    pooled = jnp.mean(x_nchw, axis=(2, 3))
    feat = pooled @ wb + bb
    h = jnp.maximum(feat @ w1 + b1, 0.0)
    return h @ w2 + b2


if __name__ == "__main__":
    B, C, H, W = 2, 4, 16, 16
    key = jax.random.PRNGKey(0)
    x = jax.random.normal(key, (B, C, H, W), jnp.float32)

    params = init_params(C)
    ref = reference_forward(x, params)

    # Default config: full-S spatial block (single spatial step), no padded x copy.
    out = jax.block_until_ready(medical_parameters_forward(x, params))
    assert out.shape == (B, NUM_TARGETS)
    assert jnp.allclose(out, ref, atol=1e-4, rtol=1e-4)

    # Tiny block budget forces multiple spatial steps, exercising the pipelined
    # accumulate / finalize (pl.when) path at this small test size.
    out_tiled = jax.block_until_ready(
        medical_parameters_forward(x, params, target_block_bytes=4096))
    assert out_tiled.shape == (B, NUM_TARGETS)
    assert jnp.allclose(out_tiled, ref, atol=1e-4, rtol=1e-4)

    print("KERNEL_OK")
</pallas_src>

<mosaic_0001>
module attributes {stable_mosaic.version = 11 : i64} {
  func.func @_medparam_kernel(%arg0: i32, %arg1: i32, %arg2: memref<8x256xf32, #tpu.memory_space<vmem>>, %arg3: memref<8x32xf32, #tpu.memory_space<vmem>>, %arg4: memref<1x32xf32, #tpu.memory_space<vmem>>, %arg5: memref<8x8xf32, #tpu.memory_space<vmem>>, %arg6: memref<32x128xf32, #tpu.memory_space<vmem>>, %arg7: memref<1x128xf32, #tpu.memory_space<vmem>>, %arg8: memref<8x128xf32, #tpu.memory_space<vmem>>, %arg9: memref<8x128xf32, #tpu.memory_space<vmem>>) attributes {dimension_semantics = [#tpu.dimension_semantics<parallel>, #tpu.dimension_semantics<arbitrary>], iteration_bounds = array<i64: 1, 1>, scalar_prefetch = 0 : i64, scratch_operands = 1 : i64, tpu.core_type = #tpu.core_type<tc>, window_params = [{transform_indices = @transform_0, window_bounds = array<i64: 8, 256>}, {pipeline_mode = #tpu.pipeline_mode<synchronous>, transform_indices = @transform_1, window_bounds = array<i64: 8, 32>}, {pipeline_mode = #tpu.pipeline_mode<synchronous>, transform_indices = @transform_2, window_bounds = array<i64: 1, 32>}, {pipeline_mode = #tpu.pipeline_mode<synchronous>, transform_indices = @transform_3, window_bounds = array<i64: 8, 8>}, {pipeline_mode = #tpu.pipeline_mode<synchronous>, transform_indices = @transform_4, window_bounds = array<i64: 32, 128>}, {pipeline_mode = #tpu.pipeline_mode<synchronous>, transform_indices = @transform_5, window_bounds = array<i64: 1, 128>}, {transform_indices = @transform_6, window_bounds = array<i64: 8, 128>}]} {
    %c0_i32 = arith.constant 0 : i32
    %0 = arith.cmpi eq, %arg1, %c0_i32 : i32
    %1 = arith.extui %0 : i1 to i32
    %c0_i32_0 = arith.constant 0 : i32
    %2 = arith.cmpi ne, %1, %c0_i32_0 : i32
    scf.if %2 {
      %cst = arith.constant 0.000000e+00 : f32
      %12 = vector.broadcast %cst : f32 to vector<8x128xf32>
      %c0_9 = arith.constant 0 : index
      %c0_10 = arith.constant 0 : index
      %13 = vector.load %arg9[%c0_9, %c0_10] : memref<8x128xf32, #tpu.memory_space<vmem>>, vector<8x128xf32>
      tpu.vector_store %arg9[%c0_9, %c0_10], %12 {strides = array<i32>} : memref<8x128xf32, #tpu.memory_space<vmem>>, vector<8x128xf32>,
    } else {
    }
    %c0 = arith.constant 0 : index
    %c0_1 = arith.constant 0 : index
    %3 = vector.load %arg9[%c0, %c0_1] : memref<8x128xf32, #tpu.memory_space<vmem>>, vector<8x128xf32>
    %c0_2 = arith.constant 0 : index
    %c0_3 = arith.constant 0 : index
    %4 = vector.load %arg2[%c0_2, %c0_3] : memref<8x256xf32, #tpu.memory_space<vmem>>, vector<8x128xf32>
    %5 = arith.addf %3, %4 : vector<8x128xf32>
    %c0_4 = arith.constant 0 : index
    %c128 = arith.constant 128 : index
    %6 = vector.load %arg2[%c0_4, %c128] : memref<8x256xf32, #tpu.memory_space<vmem>>, vector<8x128xf32>
    %7 = arith.addf %5, %6 : vector<8x128xf32>
    %c0_5 = arith.constant 0 : index
    %c0_6 = arith.constant 0 : index
    %8 = vector.load %arg9[%c0_5, %c0_6] : memref<8x128xf32, #tpu.memory_space<vmem>>, vector<8x128xf32>
    tpu.vector_store %arg9[%c0_5, %c0_6], %7 {strides = array<i32>} : memref<8x128xf32, #tpu.memory_space<vmem>>, vector<8x128xf32>,
    %c0_i32_7 = arith.constant 0 : i32
    %9 = arith.cmpi eq, %arg1, %c0_i32_7 : i32
    %10 = arith.extui %9 : i1 to i32
    %c0_i32_8 = arith.constant 0 : i32
    %11 = arith.cmpi ne, %10, %c0_i32_8 : i32
    scf.if %11 {
      %c0_9 = arith.constant 0 : index
      %c0_10 = arith.constant 0 : index
      %12 = vector.load %arg9[%c0_9, %c0_10] : memref<8x128xf32, #tpu.memory_space<vmem>>, vector<8x128xf32>
      %cst = arith.constant dense<0.000000e+00> : vector<8xf32>
      %13 = vector.multi_reduction <add>, %12, %cst [1] : vector<8x128xf32> to vector<8xf32>
      %14 = vector.shape_cast %13 : vector<8xf32> to vector<8x1xf32>
      %c0_11 = arith.constant 0 : index
      %c0_12 = arith.constant 0 : index
      %15 = vector.load %arg3[%c0_11, %c0_12] : memref<8x32xf32, #tpu.memory_space<vmem>>, vector<8x32xf32>
      %16 = vector.broadcast %14 : vector<8x1xf32> to vector<8x32xf32>
      %17 = arith.mulf %16, %15 : vector<8x32xf32>
      %c0_13 = arith.constant 0 : index
      %c0_14 = arith.constant 0 : index
      %18 = vector.load %arg5[%c0_13, %c0_14] : memref<8x8xf32, #tpu.memory_space<vmem>>, vector<8x8xf32>
      %cst_15 = arith.constant dense<0.000000e+00> : vector<8x32xf32>
      %19 = tpu.matmul %18, %17, %cst_15 {dimension_numbers = #tpu.dot_dimension_numbers<[1], [0], [0], [1], [0, 0, 1, 1], [], []>} : vector<8x8xf32>, vector<8x32xf32>, vector<8x32xf32> -> vector<8x32xf32>
      %c0_16 = arith.constant 0 : index
      %c0_17 = arith.constant 0 : index
      %20 = vector.load %arg4[%c0_16, %c0_17] : memref<1x32xf32, #tpu.memory_space<vmem>>, vector<1x32xf32>
      %21 = vector.broadcast %20 : vector<1x32xf32> to vector<8x32xf32>
      %22 = arith.addf %19, %21 : vector<8x32xf32>
      %cst_18 = arith.constant 0.000000e+00 : f32
      %23 = vector.broadcast %cst_18 : f32 to vector<8x32xf32>
      %24 = arith.maximumf %22, %23 : vector<8x32xf32>
      %c0_19 = arith.constant 0 : index
      %c0_20 = arith.constant 0 : index
      %25 = vector.load %arg6[%c0_19, %c0_20] : memref<32x128xf32, #tpu.memory_space<vmem>>, vector<32x128xf32>
      %cst_21 = arith.constant dense<0.000000e+00> : vector<8x128xf32>
      %26 = tpu.matmul %24, %25, %cst_21 {dimension_numbers = #tpu.dot_dimension_numbers<[1], [0], [0], [1], [0, 0, 1, 1], [], []>} : vector<8x32xf32>, vector<32x128xf32>, vector<8x128xf32> -> vector<8x128xf32>
      %c0_22 = arith.constant 0 : index
      %c0_23 = arith.constant 0 : index
      %27 = vector.load %arg7[%c0_22, %c0_23] : memref<1x128xf32, #tpu.memory_space<vmem>>, vector<1x128xf32>
      %28 = vector.broadcast %27 : vector<1x128xf32> to vector<8x128xf32>
      %29 = arith.addf %26, %28 : vector<8x128xf32>
      %c0_24 = arith.constant 0 : index
      %c0_25 = arith.constant 0 : index
      %30 = vector.load %arg8[%c0_24, %c0_25] : memref<8x128xf32, #tpu.memory_space<vmem>>, vector<8x128xf32>
      tpu.vector_store %arg8[%c0_24, %c0_25], %29 {strides = array<i32>} : memref<8x128xf32, #tpu.memory_space<vmem>>, vector<8x128xf32>,
    } else {
    }
    return
  }
  func.func @transform_0(%arg0: i32, %arg1: i32) -> (i32, i32) {
    %c0_i32 = arith.constant 0 : i32
    return %arg0, %arg1 : i32, i32
  }
  func.func @transform_1(%arg0: i32, %arg1: i32) -> (i32, i32) {
    %c0_i32 = arith.constant 0 : i32
    %c0_i32_0 = arith.constant 0 : i32
    %c0_i32_1 = arith.constant 0 : i32
    return %c0_i32, %c0_i32_0 : i32, i32
  }
  func.func @transform_2(%arg0: i32, %arg1: i32) -> (i32, i32) {
    %c0_i32 = arith.constant 0 : i32
    %c0_i32_0 = arith.constant 0 : i32
    %c0_i32_1 = arith.constant 0 : i32
    return %c0_i32, %c0_i32_0 : i32, i32
  }
  func.func @transform_3(%arg0: i32, %arg1: i32) -> (i32, i32) {
    %c0_i32 = arith.constant 0 : i32
    %c0_i32_0 = arith.constant 0 : i32
    %c0_i32_1 = arith.constant 0 : i32
    return %c0_i32, %c0_i32_0 : i32, i32
  }
  func.func @transform_4(%arg0: i32, %arg1: i32) -> (i32, i32) {
    %c0_i32 = arith.constant 0 : i32
    %c0_i32_0 = arith.constant 0 : i32
    %c0_i32_1 = arith.constant 0 : i32
    return %c0_i32, %c0_i32_0 : i32, i32
  }
  func.func @transform_5(%arg0: i32, %arg1: i32) -> (i32, i32) {
    %c0_i32 = arith.constant 0 : i32
    %c0_i32_0 = arith.constant 0 : i32
    %c0_i32_1 = arith.constant 0 : i32
    return %c0_i32, %c0_i32_0 : i32, i32
  }
  func.func @transform_6(%arg0: i32, %arg1: i32) -> (i32, i32) {
    %c0_i32 = arith.constant 0 : i32
    %c0_i32_0 = arith.constant 0 : i32
    return %arg0, %c0_i32 : i32, i32
  }
}

</mosaic_0001>

<bundles_post_ra>
// kernel: tpu_custom_call.1
= control target key start
LH: loop header
LB: loop body
LE: loop exit
PB: predicated region body
PF: predicated region fallthrough
CT: control target
= control target key end

     0   :  { %11 = vsyncpa [#allocation4], 0  ;;  %s502_s0 = inlined_call_operand.hbm [shape: f32[8,256], index: 0, kind: input, shape index: {}]   ;;  %s503_s1 = inlined_call_operand.hbm [shape: f32[8,32], index: 1, kind: input, shape index: {}]   ;;  %s504_s2 = inlined_call_operand.vmem [shape: f32[1,32], index: 2, kind: input, shape index: {}]   ;;  %s505_s3 = inlined_call_operand.vmem [shape: f32[8,8], index: 3, kind: input, shape index: {}]   ;;  %s506_s4 = inlined_call_operand.hbm [shape: f32[32,128], index: 4, kind: input, shape index: {}]   ;;  %s507_s5 = inlined_call_operand.vmem [shape: f32[1,128], index: 5, kind: input, shape index: {}]   ;;  %s508_s6 = inlined_call_operand.hbm [shape: f32[8,128], index: 6, kind: output, shape index: {}]  }
   0x1   :  { %12 = vsyncpa [#allocation7], 0 }
   0x2   :  { %13 = vsyncpa [#allocation5], 0  ;;  %s401_s21 = smov [#allocation6]   ;;  %s402_s23 = smov [#allocation3]  }
   0x3   :  { %s30_s22 = sshll.u32 %s401_s21, 4  ;;  %s20_s24 = sshll.u32 %s402_s23, 4  ;;  %s31_s22 = int_to_ptr.vmem [resolvable:$true] %s30_s22  ;;  %s21_s24 = int_to_ptr.vmem [resolvable:$true] %s20_s24 }
   0x4   :  { %s307_s27 = scalar_lea.hbm %s503_s1, 128 }
   0x5   :  { %p308_p0 = scmp.ne.s32.totalorder %s503_s1, %s307_s27  ;;  %p311_p1 = scmp.lt.u32.totalorder %s307_s27, %s503_s1 }
   0x7   :  { %p313_p2 = pnand %p311_p1, %p308_p0 }
   0x9   :  { %316 = shalt.err (!%p313_p2)
}
   0xa   :  { %s317_s8 = scalar_lea.vmem %s31_s22, 128  ;;  %p322_p4 = scmp.lt.s32.totalorder %s31_s22, %s31_s22 }
   0xb   :  { %p318_p3 = scmp.ne.s32.totalorder %s31_s22, %s317_s8  ;;  %p323_p5 = scmp.lt.s32.totalorder %s317_s8, %s317_s8 }
   0xd   :  { %p324_p6 = por %p323_p5, %p322_p4 }
   0xf   :  { %p325_p7 = pnand %p324_p6, %p318_p3 }
  0x11   :  { %328 = shalt.err (!%p325_p7)
}
  0x12   :  { %33 = dma.hbm_to_vmem [thread:$0]  %s503_s1, 128, %s31_s22, [#allocation7]  }
  0x13   :  { %s329_s13 = scalar_lea.hbm %s502_s0, 256 }
  0x14   :  { %p330_p8 = scmp.ne.s32.totalorder %s502_s0, %s329_s13  ;;  %p333_p9 = scmp.lt.u32.totalorder %s329_s13, %s502_s0 }
  0x16   :  { %p335_p10 = pnand %p333_p9, %p330_p8 }
  0x18   :  { %338 = shalt.err (!%p335_p10)
}
  0x19   :  { %s339_s18 = scalar_lea.vmem %s21_s24, 256  ;;  %p344_p12 = scmp.lt.s32.totalorder %s21_s24, %s21_s24 }
  0x1a   :  { %p340_p11 = scmp.ne.s32.totalorder %s21_s24, %s339_s18  ;;  %p345_p13 = scmp.lt.s32.totalorder %s339_s18, %s339_s18 }
  0x1c   :  { %p346_p0 = por %p345_p13, %p344_p12 }
  0x1e   :  { %p347_p1 = pnand %p346_p0, %p340_p11 }
  0x20   :  { %350 = shalt.err (!%p347_p1)
}
  0x21   :  { %23 = dma.hbm_to_vmem [thread:$0]  %s502_s0, 256, %s21_s24, [#allocation4]  }
  0x22   :  { %s403_s20 = smov [#allocation8]   ;;  %s351_s25 = scalar_lea.hbm %s506_s4, 512 }
  0x23   :  { %s43_s21 = sshll.u32 %s403_s20, 4  ;;  %p352_p2 = scmp.ne.s32.totalorder %s506_s4, %s351_s25  ;;  %s44_s21 = int_to_ptr.vmem [resolvable:$true] %s43_s21 }
  0x24   :  { %p355_p3 = scmp.lt.u32.totalorder %s351_s25, %s506_s4 }
  0x26   :  { %p357_p4 = pnand %p355_p3, %p352_p2 }
  0x28   :  { %360 = shalt.err (!%p357_p4)
}
  0x29   :  { %s361_s30 = scalar_lea.vmem %s44_s21, 512  ;;  %p366_p6 = scmp.lt.s32.totalorder %s44_s21, %s44_s21 }
  0x2a   :  { %p362_p5 = scmp.ne.s32.totalorder %s44_s21, %s361_s30  ;;  %p367_p7 = scmp.lt.s32.totalorder %s361_s30, %s361_s30 }
  0x2c   :  { %p368_p8 = por %p367_p7, %p366_p6 }
  0x2e   :  { %p369_p9 = pnand %p368_p8, %p362_p5 }
  0x30   :  { %372 = shalt.err (!%p369_p9)
}
  0x31   :  { %s404_s0 = smov 128   ;;  %s405_s24 = smov 8  }
  0x32   :  { %49 = dma.hbm_to_vmem [thread:$0]  %s506_s4, 512, %s44_s21, [#allocation7], %s404_s0, %s404_s0, %s405_s24  }
  0x33   :  { %395 = dma.done.wait [#allocation4], 256  }
  0x34   :  { %396 = vsyncadd [#allocation4], 4294967040 }
  0x35   :  { %397 = dma.done.wait [#allocation7], 640  }
  0x36   :  { %398 = vsyncadd [#allocation7], 4294966656  ;;  %v67_v0 = vld [vmem:[#allocation3] sm:$0xff]  ;;  %v69_v1 = vld [vmem:[#allocation3 + $0x8] sm:$0xff]  ;;  %v406_v3 = vmov 0.0   ;;  %vm407_vm0 = vmmov 0  }
  0x37   :  { %v70_v2 = vadd.f32 %v69_v1, %v67_v0  ;;  %276 = vmatprep.subr.mxu0 %v406_v3  ;;  %278 = vmatprep.mubr.msk.f32.mxu0 %vm407_vm0, %v406_v3  ;;  %v163_v4 = vld [vmem:[#allocation8] sm:$0xff]  ;;  %v164_v5 = vld [vmem:[#allocation8 + $0x8] sm:$0xff]  ;;  %v408_v6 = vmov 0.0|0.0   ;;  %v78_v8 = vld [vmem:[#allocation6] sm:$0xff]  ;;  %vm88_vm1 = vcmask 64512   ;;  %vm174_vm2 = vcmask 261120  }
  0x38   :  { %289 = vmatprep.mubr.msk.f32.mxu1 %vm407_vm0, %v406_v3  ;;  %292 = vmatprep.subr.bf16.mxu1 %v408_v6  ;;  %v293_v7 = vpack.c.bf16 %v164_v5, %v163_v4  ;;  %v80_v11 = vld [vmem:[%s505_s3] sm:$0xff]  ;;  %v165_v12 = vld [vmem:[#allocation8 + $0x10] sm:$0xff]  ;;  %v166_v13 = vld [vmem:[#allocation8 + $0x18] sm:$0xff]  ;;  %s409_s3 = smov [#allocation9]  }
  0x39   :  { %76 = vadd.xlane.f32.xlu0 %v70_v2  ;;  %v296_v14 = vpack.c.bf16 %v166_v13, %v165_v12  ;;  %v265_v15 = vld [vmem:[%s504_s2] ss:$0 sm:$0xff]  ;;  %s255_s14 = sshll.u32 %s409_s3, 4  ;;  %s256_s14 = int_to_ptr.vmem [resolvable:$true] %s255_s14 }
  0x3a   :  { %294 = vmatpush3.bf16.msra.mxu1 %v293_v7  ;;  %v267_v20 = vld [vmem:[%s507_s5] ss:$0 sm:$0xff]  ;;  %s373_s15 = scalar_lea.vmem %s256_s14, 128  ;;  %p378_p11 = scmp.lt.s32.totalorder %s256_s14, %s256_s14 }
  0x3b   :  { %295 = vmatprep.subr.bf16.mxu1 %v408_v6  ;;  %p374_p10 = scmp.ne.s32.totalorder %s256_s14, %s373_s15  ;;  %p379_p12 = scmp.lt.s32.totalorder %s373_s15, %s373_s15 }
  0x3d   :  { %p380_p13 = por %p379_p12, %p378_p11 }
  0x3e   :  { %297 = vmatpush3.bf16.msra.mxu1 %v296_v14 }
  0x3f   :  { %p381_p0 = pnand %p380_p13, %p374_p10 }
  0xc6   :  { %v77_v9 = vpop.xlane.xlu0 %76 }
  0xc7   :  { %v79_v10 = vmul.f32 %v78_v8, %v77_v9 }
  0xc9   :  { %277 = vmatpush3.msra.mxu0 %v79_v10 }
  0xca   :  { %279 = vmatmul.mubr.msk.f32.vlgmr.msra.gmra.mrb[0].mxu0 %vm88_vm1, %v80_v11 }
 0x19d   :  { %v158_v16 = vpop.f32.mrb[0].mxu0 }
 0x19e   :  { %v159_v17 = vadd.f32 %v265_v15, %v158_v16  ;;  %v280_v18 = vpop.f32.mrb[1].mxu0 }
 0x1a0   :  { %v162_v19 = vmax.f32 %v159_v17, 0.0 }
 0x1a2   :  { %290 = vmatmul.mubr.msk.f32.vlgmr.msra.gmra.mrb[0].mxu1 %vm174_vm2, %v162_v19 }
 0x275   :  { %v244_v21 = vpop.f32.mrb[0].mxu1 }
 0x276   :  { %v245_v22 = vadd.f32 %v267_v20, %v244_v21  ;;  %v291_v23 = vpop.f32.mrb[1].mxu1 }
 0x278   :  { %248 = vst [vmem:[#allocation9] sm:$0xff] %v245_v22 }
 0x279   :  { %384 = shalt.err (!%p381_p0)
}
 0x27a   :  { %s385_s17 = scalar_lea.hbm %s508_s6, 128 }
 0x27b   :  { %p386_p1 = scmp.ne.s32.totalorder %s508_s6, %s385_s17  ;;  %p389_p2 = scmp.lt.u32.totalorder %s385_s17, %s508_s6 }
 0x27d   :  { %p391_p3 = pnand %p389_p2, %p386_p1 }
 0x27f   :  { %394 = shalt.err (!%p391_p3)
}
 0x280   :  { %258 = dma.vmem_to_hbm [thread:$0]  %s256_s14, 128, %s508_s6, [#allocation5]  }
 0x281   :  { %399 = dma.done.wait [#allocation5], 128  }
 0x282   :  { %400 = vsyncadd [#allocation5], 4294967168 }
 0x283   :  { %262 = vsyncpa [#allocation4], 1 }
 0x284   :  { %263 = vsyncpa [#allocation7], 1 }
 0x285   :  { %264 = vsyncpa [#allocation5], 1 }

</bundles_post_ra>
